<compile_context>
chip_gen: v7x
topology: tpu7x:2x2x1
jax: 0.10.0
libtpu: 0.0.40
codegen_flags: <defaults>
</compile_context>

<pallas_src>
import jax
import jax.numpy as jnp
from jax.experimental import pallas as pl
from jax.experimental.pallas import tpu as pltpu

LANE = 128
MAX_ROWS_PER_TILE = 4096   # (4096, 128) f32 tile = 2 MiB per stream per buffer
NUM_CORES = 2              # leading "parallel" grid axis (megacore on v7x)
PAD_LOGIT = -30.0          # sigmoid(-30) ~ 9e-14  =>  padding needs no mask


def _row_granularity(dtype):
    # sublane granularity so (rows, 128) blocks respect TPU tiling per dtype
    return {4: 8, 2: 16, 1: 32}.get(jnp.dtype(dtype).itemsize, 8)


def _dice_bce_partials_kernel(x_ref, t_ref, out_ref, acc_ref):
    i = pl.program_id(1)

    @pl.when(i == 0)
    def _init():
        acc_ref[...] = jnp.zeros_like(acc_ref)

    x = x_ref[...].astype(jnp.float32)
    t = t_ref[...].astype(jnp.float32)

    # One shared exp for sigmoid + the stable BCE log-term.
    e = jnp.exp(-jnp.abs(x))
    d = 1.0 + e
    r = pl.reciprocal(d, approx=True)          # EUP slot (nearly free)
    r = r * (2.0 - d * r)                      # one Newton step -> ~f32 accuracy
    p = jnp.where(x >= 0.0, 1.0, e) * r        # sigmoid(x)
    # stable BCE-with-logits: max(x,0) - x*t + log1p(exp(-|x|))
    bce = jnp.maximum(x, 0.0) - x * t + jnp.log1p(e)

    rows = x.shape[0]

    def fold(v):
        # (rows, 128) -> (8, 128) partial: sum over sublane groups of 8.
        # The reshape aligns with the native (8,128) tiling, so this is a
        # sequence of vreg adds with no relayout.
        return jnp.sum(v.reshape(rows // 8, 8, LANE), axis=0)

    acc_ref[0] += fold(p * t)    # intersection
    acc_ref[1] += fold(p)        # sum(sigmoid(logits))
    acc_ref[2] += fold(t)        # sum(targets)
    acc_ref[3] += fold(bce)      # BCE numerator

    @pl.when(i == pl.num_programs(1) - 1)
    def _finalize():
        out_ref[0] = acc_ref[...]   # per-core (4, 8, 128) partial sums


def dice_xentropy(logits, targets, smooth=1.0, targets_stream_dtype=None):
    x = logits.reshape(-1)
    t = targets.reshape(-1)
    if targets_stream_dtype is not None:
        # Narrow the targets HBM stream (big win on HBM-bound v5e/v6e).  Only
        # use when targets are exactly representable in the narrow dtype
        # (e.g. binary masks in bf16 / uint8).
        t = t.astype(targets_stream_dtype)
    n = x.shape[0]

    gran = max(_row_granularity(x.dtype), _row_granularity(t.dtype))
    rows = pl.cdiv(max(n, 1), LANE * gran) * gran          # multiple of gran
    rpt = min(MAX_ROWS_PER_TILE, rows)                     # rows per tile
    steps_per_core = pl.cdiv(rows, NUM_CORES * rpt)
    rows_padded = NUM_CORES * steps_per_core * rpt
    pad = rows_padded * LANE - n
    if pad:
        # Pad logits with a large negative value (contributes ~9e-14 per
        # element to p_sum / bce_sum) and targets with 0 -> no in-kernel mask.
        x = jnp.pad(x, (0, pad), constant_values=PAD_LOGIT)
        t = jnp.pad(t, (0, pad))

    x2 = x.reshape(rows_padded, LANE)
    t2 = t.reshape(rows_padded, LANE)

    in_block = pl.BlockSpec((rpt, LANE), lambda c, i: (c * steps_per_core + i, 0))
    partials = pl.pallas_call(
        _dice_bce_partials_kernel,
        out_shape=jax.ShapeDtypeStruct((NUM_CORES, 4, 8, LANE), jnp.float32),
        grid_spec=pltpu.PrefetchScalarGridSpec(
            num_scalar_prefetch=0,
            grid=(NUM_CORES, steps_per_core),
            in_specs=[in_block, in_block],
            out_specs=pl.BlockSpec((1, 4, 8, LANE), lambda c, i: (c, 0, 0, 0)),
            scratch_shapes=[pltpu.VMEM((4, 8, LANE), jnp.float32)],
        ),
        compiler_params=pltpu.CompilerParams(
            dimension_semantics=("parallel", "arbitrary"),
            vmem_limit_bytes=32 * 1024 * 1024,
        ),
    )(x2, t2)

    # Combine the per-core / per-lane partials (tiny XLA reduce) and finish.
    sums = jnp.sum(partials, axis=(0, 2, 3))               # (4,)
    inter, p_sum, t_sum, bce_sum = sums[0], sums[1], sums[2], sums[3]
    dice = (2.0 * inter + smooth) / (p_sum + t_sum + smooth)
    bce_mean = bce_sum / jnp.float32(max(n, 1))             # guard n == 0
    return (1.0 - dice) + bce_mean


def _reference(logits, targets, smooth=1.0):
    x = logits.astype(jnp.float32)
    t = targets.astype(jnp.float32)
    p = jax.nn.sigmoid(x)
    inter = jnp.sum(p * t)
    dice = (2.0 * inter + smooth) / (jnp.sum(p) + jnp.sum(t) + smooth)
    bce = jnp.mean(jnp.maximum(x, 0.0) - x * t + jnp.log1p(jnp.exp(-jnp.abs(x))))
    return (1.0 - dice) + bce


if __name__ == "__main__":
    key = jax.random.PRNGKey(0)
    k1, k2 = jax.random.split(key)
    B, C, H, W = 2, 4, 16, 16
    logits = jax.random.normal(k1, (B, C, H, W), dtype=jnp.float32)
    targets = (jax.random.uniform(k2, (B, C, H, W)) < 0.5).astype(jnp.float32)

    # Binary targets are exact in bf16 -> halve the targets HBM stream.
    loss = dice_xentropy(logits, targets, smooth=1.0,
                         targets_stream_dtype=jnp.bfloat16)
    loss = jax.block_until_ready(loss)

    ref = _reference(logits, targets, smooth=1.0)
    assert jnp.allclose(loss, ref, rtol=1e-5, atol=1e-5), (loss, ref)
    print("KERNEL_OK")
</pallas_src>

<mosaic_0001>
module attributes {stable_mosaic.version = 11 : i64} {
  func.func @_dice_bce_partials_kernel(%arg0: i32, %arg1: i32, %arg2: memref<16x128xf32, #tpu.memory_space<vmem>>, %arg3: memref<16x128xbf16, #tpu.memory_space<vmem>>, %arg4: memref<1x4x8x128xf32, #tpu.memory_space<vmem>>, %arg5: memref<4x8x128xf32, #tpu.memory_space<vmem>>) attributes {dimension_semantics = [#tpu.dimension_semantics<parallel>, #tpu.dimension_semantics<arbitrary>], iteration_bounds = array<i64: 2, 1>, scalar_prefetch = 0 : i64, scratch_operands = 1 : i64, tpu.core_type = #tpu.core_type<tc>, window_params = [{transform_indices = @transform_0, window_bounds = array<i64: 16, 128>}, {transform_indices = @transform_1, window_bounds = array<i64: 16, 128>}, {transform_indices = @transform_2, window_bounds = array<i64: 1, 4, 8, 128>}]} {
    %c0_i32 = arith.constant 0 : i32
    %0 = arith.cmpi eq, %arg1, %c0_i32 : i32
    %1 = arith.extui %0 : i1 to i32
    %c0_i32_0 = arith.constant 0 : i32
    %2 = arith.cmpi ne, %1, %c0_i32_0 : i32
    scf.if %2 {
      %cst_36 = arith.constant 0.000000e+00 : f32
      %64 = vector.broadcast %cst_36 : f32 to vector<4x8x128xf32>
      %c0_37 = arith.constant 0 : index
      %c0_38 = arith.constant 0 : index
      %c0_39 = arith.constant 0 : index
      %65 = vector.load %arg5[%c0_37, %c0_38, %c0_39] : memref<4x8x128xf32, #tpu.memory_space<vmem>>, vector<4x8x128xf32>
      tpu.vector_store %arg5[%c0_37, %c0_38, %c0_39], %64 {strides = array<i32>} : memref<4x8x128xf32, #tpu.memory_space<vmem>>, vector<4x8x128xf32>,
    } else {
    }
    %c0 = arith.constant 0 : index
    %c0_1 = arith.constant 0 : index
    %3 = vector.load %arg2[%c0, %c0_1] : memref<16x128xf32, #tpu.memory_space<vmem>>, vector<16x128xf32>
    %c0_2 = arith.constant 0 : index
    %c0_3 = arith.constant 0 : index
    %4 = vector.load %arg3[%c0_2, %c0_3] : memref<16x128xbf16, #tpu.memory_space<vmem>>, vector<16x128xbf16>
    %5 = arith.extf %4 : vector<16x128xbf16> to vector<16x128xf32>
    %6 = math.absf %3 : vector<16x128xf32>
    %cst = arith.constant 0.000000e+00 : f32
    %7 = vector.broadcast %cst : f32 to vector<16x128xf32>
    %8 = arith.subf %7, %6 : vector<16x128xf32>
    %9 = math.exp %8 : vector<16x128xf32>
    %cst_4 = arith.constant 1.000000e+00 : f32
    %10 = vector.broadcast %cst_4 : f32 to vector<16x128xf32>
    %11 = arith.addf %10, %9 : vector<16x128xf32>
    %12 = tpu.reciprocal %11 {approx = true} : vector<16x128xf32> -> vector<16x128xf32>
    %13 = arith.mulf %11, %12 : vector<16x128xf32>
    %cst_5 = arith.constant 2.000000e+00 : f32
    %14 = vector.broadcast %cst_5 : f32 to vector<16x128xf32>
    %15 = arith.subf %14, %13 : vector<16x128xf32>
    %16 = arith.mulf %12, %15 : vector<16x128xf32>
    %cst_6 = arith.constant 0.000000e+00 : f32
    %17 = vector.broadcast %cst_6 : f32 to vector<16x128xf32>
    %18 = arith.cmpf oge, %3, %17 : vector<16x128xf32>
    %cst_7 = arith.constant 1.000000e+00 : f32
    %19 = vector.broadcast %cst_7 : f32 to vector<16x128xf32>
    %20 = arith.select %18, %19, %9 : vector<16x128xi1>, vector<16x128xf32>
    %21 = arith.mulf %20, %16 : vector<16x128xf32>
    %cst_8 = arith.constant 0.000000e+00 : f32
    %22 = vector.broadcast %cst_8 : f32 to vector<16x128xf32>
    %23 = arith.maximumf %3, %22 : vector<16x128xf32>
    %24 = arith.mulf %3, %5 : vector<16x128xf32>
    %25 = arith.subf %23, %24 : vector<16x128xf32>
    %26 = math.log1p %9 : vector<16x128xf32>
    %27 = arith.addf %25, %26 : vector<16x128xf32>
    %c0_9 = arith.constant 0 : index
    %c0_10 = arith.constant 0 : index
    %c0_11 = arith.constant 0 : index
    %28 = vector.load %arg5[%c0_9, %c0_10, %c0_11] : memref<4x8x128xf32, #tpu.memory_space<vmem>>, vector<1x8x128xf32>
    %29 = vector.shape_cast %28 : vector<1x8x128xf32> to vector<8x128xf32>
    %30 = arith.mulf %21, %5 : vector<16x128xf32>
    %31 = vector.shape_cast %30 : vector<16x128xf32> to vector<2x8x128xf32>
    %cst_12 = arith.constant dense<0.000000e+00> : vector<8x128xf32>
    %32 = vector.multi_reduction <add>, %31, %cst_12 [0] : vector<2x8x128xf32> to vector<8x128xf32>
    %33 = arith.addf %29, %32 : vector<8x128xf32>
    %c0_13 = arith.constant 0 : index
    %c0_14 = arith.constant 0 : index
    %c0_15 = arith.constant 0 : index
    %34 = vector.load %arg5[%c0_13, %c0_14, %c0_15] : memref<4x8x128xf32, #tpu.memory_space<vmem>>, vector<1x8x128xf32>
    %35 = vector.shape_cast %34 : vector<1x8x128xf32> to vector<8x128xf32>
    %36 = vector.shape_cast %33 : vector<8x128xf32> to vector<1x8x128xf32>
    tpu.vector_store %arg5[%c0_13, %c0_14, %c0_15], %36 {strides = array<i32>} : memref<4x8x128xf32, #tpu.memory_space<vmem>>, vector<1x8x128xf32>,
    %c1 = arith.constant 1 : index
    %c0_16 = arith.constant 0 : index
    %c0_17 = arith.constant 0 : index
    %37 = vector.load %arg5[%c1, %c0_16, %c0_17] : memref<4x8x128xf32, #tpu.memory_space<vmem>>, vector<1x8x128xf32>
    %38 = vector.shape_cast %37 : vector<1x8x128xf32> to vector<8x128xf32>
    %39 = vector.shape_cast %21 : vector<16x128xf32> to vector<2x8x128xf32>
    %cst_18 = arith.constant dense<0.000000e+00> : vector<8x128xf32>
    %40 = vector.multi_reduction <add>, %39, %cst_18 [0] : vector<2x8x128xf32> to vector<8x128xf32>
    %41 = arith.addf %38, %40 : vector<8x128xf32>
    %c1_19 = arith.constant 1 : index
    %c0_20 = arith.constant 0 : index
    %c0_21 = arith.constant 0 : index
    %42 = vector.load %arg5[%c1_19, %c0_20, %c0_21] : memref<4x8x128xf32, #tpu.memory_space<vmem>>, vector<1x8x128xf32>
    %43 = vector.shape_cast %42 : vector<1x8x128xf32> to vector<8x128xf32>
    %44 = vector.shape_cast %41 : vector<8x128xf32> to vector<1x8x128xf32>
    tpu.vector_store %arg5[%c1_19, %c0_20, %c0_21], %44 {strides = array<i32>} : memref<4x8x128xf32, #tpu.memory_space<vmem>>, vector<1x8x128xf32>,
    %c2 = arith.constant 2 : index
    %c0_22 = arith.constant 0 : index
    %c0_23 = arith.constant 0 : index
    %45 = vector.load %arg5[%c2, %c0_22, %c0_23] : memref<4x8x128xf32, #tpu.memory_space<vmem>>, vector<1x8x128xf32>
    %46 = vector.shape_cast %45 : vector<1x8x128xf32> to vector<8x128xf32>
    %47 = vector.shape_cast %5 : vector<16x128xf32> to vector<2x8x128xf32>
    %cst_24 = arith.constant dense<0.000000e+00> : vector<8x128xf32>
    %48 = vector.multi_reduction <add>, %47, %cst_24 [0] : vector<2x8x128xf32> to vector<8x128xf32>
    %49 = arith.addf %46, %48 : vector<8x128xf32>
    %c2_25 = arith.constant 2 : index
    %c0_26 = arith.constant 0 : index
    %c0_27 = arith.constant 0 : index
    %50 = vector.load %arg5[%c2_25, %c0_26, %c0_27] : memref<4x8x128xf32, #tpu.memory_space<vmem>>, vector<1x8x128xf32>
    %51 = vector.shape_cast %50 : vector<1x8x128xf32> to vector<8x128xf32>
    %52 = vector.shape_cast %49 : vector<8x128xf32> to vector<1x8x128xf32>
    tpu.vector_store %arg5[%c2_25, %c0_26, %c0_27], %52 {strides = array<i32>} : memref<4x8x128xf32, #tpu.memory_space<vmem>>, vector<1x8x128xf32>,
    %c3 = arith.constant 3 : index
    %c0_28 = arith.constant 0 : index
    %c0_29 = arith.constant 0 : index
    %53 = vector.load %arg5[%c3, %c0_28, %c0_29] : memref<4x8x128xf32, #tpu.memory_space<vmem>>, vector<1x8x128xf32>
    %54 = vector.shape_cast %53 : vector<1x8x128xf32> to vector<8x128xf32>
    %55 = vector.shape_cast %27 : vector<16x128xf32> to vector<2x8x128xf32>
    %cst_30 = arith.constant dense<0.000000e+00> : vector<8x128xf32>
    %56 = vector.multi_reduction <add>, %55, %cst_30 [0] : vector<2x8x128xf32> to vector<8x128xf32>
    %57 = arith.addf %54, %56 : vector<8x128xf32>
    %c3_31 = arith.constant 3 : index
    %c0_32 = arith.constant 0 : index
    %c0_33 = arith.constant 0 : index
    %58 = vector.load %arg5[%c3_31, %c0_32, %c0_33] : memref<4x8x128xf32, #tpu.memory_space<vmem>>, vector<1x8x128xf32>
    %59 = vector.shape_cast %58 : vector<1x8x128xf32> to vector<8x128xf32>
    %60 = vector.shape_cast %57 : vector<8x128xf32> to vector<1x8x128xf32>
    tpu.vector_store %arg5[%c3_31, %c0_32, %c0_33], %60 {strides = array<i32>} : memref<4x8x128xf32, #tpu.memory_space<vmem>>, vector<1x8x128xf32>,
    %c0_i32_34 = arith.constant 0 : i32
    %61 = arith.cmpi eq, %arg1, %c0_i32_34 : i32
    %62 = arith.extui %61 : i1 to i32
    %c0_i32_35 = arith.constant 0 : i32
    %63 = arith.cmpi ne, %62, %c0_i32_35 : i32
    scf.if %63 {
      %c0_36 = arith.constant 0 : index
      %c0_37 = arith.constant 0 : index
      %c0_38 = arith.constant 0 : index
      %64 = vector.load %arg5[%c0_36, %c0_37, %c0_38] : memref<4x8x128xf32, #tpu.memory_space<vmem>>, vector<4x8x128xf32>
      %c0_39 = arith.constant 0 : index
      %c0_40 = arith.constant 0 : index
      %c0_41 = arith.constant 0 : index
      %c0_42 = arith.constant 0 : index
      %65 = vector.load %arg4[%c0_39, %c0_40, %c0_41, %c0_42] : memref<1x4x8x128xf32, #tpu.memory_space<vmem>>, vector<1x4x8x128xf32>
      %66 = vector.shape_cast %65 : vector<1x4x8x128xf32> to vector<4x8x128xf32>
      %67 = vector.shape_cast %64 : vector<4x8x128xf32> to vector<1x4x8x128xf32>
      tpu.vector_store %arg4[%c0_39, %c0_40, %c0_41, %c0_42], %67 {strides = array<i32>} : memref<1x4x8x128xf32, #tpu.memory_space<vmem>>, vector<1x4x8x128xf32>,
    } else {
    }
    return
  }
  func.func @transform_0(%arg0: i32, %arg1: i32) -> (i32, i32) {
    %c1_i32 = arith.constant 1 : i32
    %0 = arith.muli %arg0, %c1_i32 : i32
    %1 = arith.addi %0, %arg1 : i32
    %c0_i32 = arith.constant 0 : i32
    %c0_i32_0 = arith.constant 0 : i32
    return %1, %c0_i32 : i32, i32
  }
  func.func @transform_1(%arg0: i32, %arg1: i32) -> (i32, i32) {
    %c1_i32 = arith.constant 1 : i32
    %0 = arith.muli %arg0, %c1_i32 : i32
    %1 = arith.addi %0, %arg1 : i32
    %c0_i32 = arith.constant 0 : i32
    %c0_i32_0 = arith.constant 0 : i32
    return %1, %c0_i32 : i32, i32
  }
  func.func @transform_2(%arg0: i32, %arg1: i32) -> (i32, i32, i32, i32) {
    %c0_i32 = arith.constant 0 : i32
    %c0_i32_0 = arith.constant 0 : i32
    %c0_i32_1 = arith.constant 0 : i32
    %c0_i32_2 = arith.constant 0 : i32
    return %arg0, %c0_i32, %c0_i32_0, %c0_i32_1 : i32, i32, i32, i32
  }
}

</mosaic_0001>

<bundles_post_ra>
// kernel: tpu_custom_call.1
= control target key start
LH: loop header
LB: loop body
LE: loop exit
PB: predicated region body
PF: predicated region fallthrough
CT: control target
= control target key end

     0   :  { %7 = vsyncpa [#allocation4], 0  ;;  %s957_s0 = inlined_call_operand.hbm [shape: f32[32,128], index: 0, kind: input, shape index: {}]   ;;  %s958_s1 = inlined_call_operand.hbm [shape: bf16[32,128], index: 1, kind: input, shape index: {}]   ;;  %s959_s2 = inlined_call_operand.hbm [shape: f32[2,4,8,128], index: 2, kind: output, shape index: {}]  }
   0x1   :  { %9 = vsyncpa [#allocation4 + $0x1], 0 }
   0x2   :  { %10 = vsyncpa [#allocation7], 0 }
   0x3   :  { %12 = vsyncpa [#allocation7 + $0x1], 0 }
   0x4   :  { %13 = vsyncpa [#allocation5], 0 }
   0x5   :  { %15 = vsyncpa [#allocation5 + $0x1], 0  ;;  %s723_s9 = smov 0   ;;  %s725_s10 = smov 0  }
   0x6   :  { %s727_s11 = smov 0   ;;  %s729_s12 = smov 0  }
   0x7   :  { %s731_s13 = smov 0   ;;  %s733_s14 = smov 0  }
   0x8 LB: > { %s440_s15 = sadd.s32 4294967295, %s697_s14   ;;  %s441_s16 = sadd.s32 4294967294, %s697_s14   ;;  %s697_s14 = sphi %s733_s14, %s21_s14   ;;  %s693_s13 = sphi %s731_s13, %s977_s13   ;;  %s689_s12 = sphi %s729_s12, %s976_s12   ;;  %s685_s11 = sphi %s727_s11, %s975_s11   ;;  %s681_s10 = sphi %s725_s10, %s974_s10   ;;  %s677_s9 = sphi %s723_s9, %s973_s9  }
   0x9   : > { %s33_s17 = sadd.s32 1, %s693_s13  ;;  %s42_s18 = sadd.s32 1, %s685_s11 }
   0xa   : > { %p35_p0 = scmp.ge.s32.totalorder %s33_s17, 2  ;;  %p49_p1 = scmp.ne.s32.totalorder %s685_s11, %s681_s10 }
   0xb   : > { %p50_p2 = scmp.eq.s32.totalorder %s697_s14, 0  ;;  %p55_p3 = scmp.ne.s32.totalorder %s681_s10, %s677_s9 }
   0xc   : > { %s979_s17 = smov (%p35_p0, %s33_s17), 0  ;;  %p56_p5 = scmp.eq.s32.totalorder %s440_s15, 0 }
   0xd   : > { %p764_p4 = por %p50_p2, %p49_p1  ;;  %s39_s20 = ssub.s32 %s693_s13, %s979_s17 }
   0xe   : > { %p107_p6 = scmp.eq.s32.totalorder %s440_s15, 1  ;;  %p40_p7 = scmp.eq.s32.totalorder %s39_s20, 0 }
   0xf   : > { %p770_p8 = por %p56_p5, %p55_p3  ;;  %p113_p10 = scmp.eq.s32.totalorder %s441_s16, 1 }
  0x10   : > { %p774_p9 = por %p107_p6, %p49_p1  ;;  %p483_p13 = scmp.lt.s32.totalorder %s697_s14, 2 }
  0x11   : > { %s963_s21 = scalar_select %p770_p8, 1, 0 }
  0x12   : > { %s964_s22 = scalar_select %p774_p9, 1, 0 }
  0x13   : > { %s779_s23 = scalar_select %p40_p7, %s685_s11, %s42_s18  }
  0x14   : > { %p781_p11 = por %p113_p10, %p55_p3  ;;  %s788_s25 = sand.u32 1, %s685_s11  }
  0x15   : > { %s444_s26 = sshll.u32 %s788_s25, 4  ;;  %s459_s27 = sshll.u32 %s693_s13, 8 }
  0x16   : > { %s965_s24 = scalar_select %p781_p11, 1, 0 }
  0x17   : > { %s795_s30 = scalar_lea.hbm %s957_s0, %s459_s27  ;;  %s137_s3 = scalar_lea.vmem [#allocation3], %s444_s26 }
  0x18   : > { %s145_s4 = sshll.u32 %s137_s3, 4  ;;  %p801_p0 = pnand %p483_p13, %p764_p4  ;;  %s797_s4 = int_to_ptr.vmem [resolvable:$true] %s145_s4 }
  0x19   : > { %s134_s6 = scalar_lea.sflag [#allocation4], %s788_s25  ;;  %s551_s7 = scalar_lea.hbm %s795_s30, 256 }
  0x1a   : > { %p552_p2 = scmp.ne.s32.totalorder %s795_s30, %s551_s7  ;;  %p553_p3 = pneg %p801_p0 }
  0x1b   : > { %s556_s16 = scalar_lea.hbm %s957_s0, 512  ;;  %p557_p4 = scmp.lt.u32.totalorder %s795_s30, %s957_s0 }
  0x1c   : > { %p554_p5 = pnand %p553_p3, %p552_p2  ;;  %p558_p7 = scmp.lt.u32.totalorder %s556_s16, %s551_s7 }
  0x1d   : > { %p560_p13 = scmp.lt.u32.totalorder %s551_s7, %s795_s30 }
  0x1e   : > { %p555_p6 = pneg %p554_p5  ;;  %p559_p10 = por %p558_p7, %p557_p4 }
  0x20   : > { %p561_p12 = por %p560_p13, %p559_p10 }
  0x22   : > { %p562_p1 = pnand %p561_p12, %p555_p6 }
  0x24   : > { %565 = shalt.err (!%p562_p1)
}
  0x25   : > { %s566_s20 = scalar_lea.vmem %s797_s4, 256  ;;  %s699_s26 = smov [#allocation3]  }
  0x26   : > { %p567_p2 = scmp.ne.s32.totalorder %s797_s4, %s566_s20  ;;  %s571_s27 = sshll.u32 %s699_s26, 4  ;;  %s572_s27 = int_to_ptr.vmem [resolvable:$false] %s571_s27 }
  0x27   : > { %s573_s28 = scalar_lea.vmem %s572_s27, 512  ;;  %p574_p9 = scmp.lt.s32.totalorder %s797_s4, %s572_s27 }
  0x28   : > { %p569_p5 = pnand %p567_p2, %p553_p3  ;;  %p575_p4 = scmp.lt.s32.totalorder %s573_s28, %s566_s20 }
  0x2a   : > { %p570_p11 = pneg %p569_p5  ;;  %p576_p7 = por %p575_p4, %p574_p9 }
  0x2c   : > { %p577_p10 = pnand %p576_p7, %p570_p11 }
  0x2e   : > { %580 = shalt.err (!%p577_p10)
}
  0x2f   : > { %s700_s29 = smov 128   ;;  %s701_s3 = smov 8  }
  0x30   : > { %475 = dma.hbm_to_vmem [thread:$0]  (!%p801_p0), %s795_s30, 256, %s797_s4, %s134_s6, %s700_s29, %s700_s29, %s701_s3  }
  0x31   : > { %p175_p12 = scmp.lt.s32.totalorder %s697_s14, 3  ;;  %s447_s7 = sshll.u32 %s788_s25, 3 }
  0x32   : > { %s460_s8 = sshll.u32 %s693_s13, 7  ;;  %p967_p9 = scmp.ge.s32.totalorder %s697_s14, 1 }
  0x33   : > { %s846_s19 = scalar_lea.hbm %s958_s1, %s460_s8  ;;  %s159_s20 = scalar_lea.vmem [#allocation6], %s447_s7 }
  0x34   : > { %p839_p11 = pnand %p967_p9, %p175_p12  ;;  %s167_s26 = sshll.u32 %s159_s20, 4  ;;  %s848_s26 = int_to_ptr.vmem [resolvable:$true] %s167_s26 }
  0x35   : > { %s156_s30 = scalar_lea.sflag [#allocation7], %s788_s25  ;;  %s581_s4 = scalar_lea.hbm %s846_s19, 128 }
  0x36   : > { %p582_p1 = scmp.ne.s32.totalorder %s846_s19, %s581_s4  ;;  %s586_s28 = scalar_lea.hbm %s958_s1, 256 }
  0x37   : > { %p587_p2 = scmp.lt.u32.totalorder %s846_s19, %s958_s1  ;;  %p588_p5 = scmp.lt.u32.totalorder %s586_s28, %s581_s4 }
  0x38   : > { %p584_p6 = pnand %p582_p1, %p553_p3  ;;  %p590_p7 = scmp.lt.u32.totalorder %s581_s4, %s846_s19 }
  0x39   : > { %p589_p4 = por %p588_p5, %p587_p2 }
  0x3a   : > { %p585_p13 = pneg %p584_p6 }
  0x3b   : > { %p591_p10 = por %p590_p7, %p589_p4 }
  0x3d   : > { %p592_p12 = pnand %p591_p10, %p585_p13 }
  0x3f   : > { %595 = shalt.err (!%p592_p12)
}
  0x40   : > { %s596_s7 = scalar_lea.vmem %s848_s26, 128  ;;  %s702_s8 = smov [#allocation6]  }
  0x41   : > { %p597_p9 = scmp.ne.s32.totalorder %s848_s26, %s596_s7  ;;  %s601_s16 = sshll.u32 %s702_s8, 4  ;;  %s602_s16 = int_to_ptr.vmem [resolvable:$false] %s601_s16 }
  0x42   : > { %s603_s18 = scalar_lea.vmem %s602_s16, 256  ;;  %p604_p8 = scmp.lt.s32.totalorder %s848_s26, %s602_s16 }
  0x43   : > { %p599_p1 = pnand %p597_p9, %p553_p3  ;;  %p605_p2 = scmp.lt.s32.totalorder %s603_s18, %s596_s7 }
  0x45   : > { %p600_p6 = pneg %p599_p1  ;;  %p606_p5 = por %p605_p2, %p604_p8 }
  0x47   : > { %p607_p4 = pnand %p606_p5, %p600_p6 }
  0x49   : > { %610 = shalt.err (!%p607_p4)
}
  0x4a   : > { %s703_s20 = smov 64   ;;  %s704_s4 = smov 4  }
  0x4b   : > { %478 = dma.hbm_to_vmem [thread:$0]  (!%p801_p0), %s846_s19, 128, %s848_s26, %s156_s30, %s703_s20, %s703_s20, %s704_s4  }
  0x4c   : > { %179 = sbr.rel (%p839_p11) target bundleno = 146 (0x92), region = 28  ;;  %s879_s6 = sand.u32 (!%p839_p11), 1, %s681_s10  }
  0x4d   : > { %s451_s27 = sshll.u32 (!%p839_p11), %s879_s6, 4  ;;  %s182_s28 = scalar_lea.sflag (!%p839_p11), [#allocation4], %s879_s6 }
  0x4e   : > { %s185_s29 = scalar_lea.vmem (!%p839_p11), [#allocation3], %s451_s27  ;;  %p969_p8 = scmp.ne.s32.totalorder (!%p839_p11), %s963_s21, 0 }
  0x53   : > { %664 = dma.done.wait (%p969_p8), %s182_s28, 256  }
  0x54   : > { %666 = vsyncadd (%p969_p8), %s182_s28, 4294967040  ;;  %s452_s25 = sshll.u32 %s879_s6, 3  ;;  %s191_s5 = scalar_lea.sflag [#allocation7], %s879_s6 }
  0x55   : > { %s194_s15 = scalar_lea.vmem [#allocation6], %s452_s25 }
  0x56   : > { %668 = dma.done.wait (%p969_p8), %s191_s5, 128  }
  0x57   : > { %670 = vsyncadd (%p969_p8), %s191_s5, 4294967168  ;;  %s453_s19 = sshll.u32 %s879_s6, 5  ;;  %v232_v0 = vld [vmem:[%s185_s29] sm:$0xff]  ;;  %v233_v1 = vld [vmem:[%s185_s29 + $0x8] sm:$0xff]  ;;  %s461_s30 = sshll.u32 %s689_s12, 9 }
  0x58   : > { %v463_v2 = vld [vmem:[%s194_s15] sm:$0xff]   ;;  %v238_v5 = vand.u32 2147483647, %v232_v0  ;;  %v239_v6 = vand.u32 2147483647, %v233_v1  ;;  %s894_s26 = scalar_lea.vmem [#allocation8], %s453_s19  ;;  %s906_s8 = scalar_lea.hbm %s959_s2, %s461_s30 }
  0x59   : > { %v464_v3 = vunpack.c.l.bf16 %v463_v2  ;;  %v465_v4 = vunpack.c.h.bf16 %v463_v2  ;;  %v262_v19 = vmax.f32 %v232_v0, 0.0  ;;  %v263_v23 = vmax.f32 %v233_v1, 0.0  ;;  %s334_s21 = sshll.u32 %s894_s26, 4  ;;  %s321_s16 = scalar_lea.sflag [#allocation5], %s879_s6  ;;  %s900_s21 = int_to_ptr.vmem [resolvable:$true] %s334_s21 }
  0x5a   : > { %v240_v7 = vsub.f32 0.0, %v238_v5  ;;  %v241_v8 = vsub.f32 0.0, %v239_v6  ;;  %vm256_vm0 = vcmp.ge.f32.partialorder %v232_v0, 0.0  ;;  %vm257_vm1 = vcmp.ge.f32.partialorder %v233_v1, 0.0  ;;  %s611_s12 = scalar_lea.vmem %s900_s21, 512  ;;  %p970_p3 = scmp.ne.s32.totalorder %s964_s22, 0 }
  0x5b   : > { %v301_v9 = vadd.f32 %v465_v4, %v464_v3  ;;  %v264_v20 = vmul.f32 %v464_v3, %v232_v0  ;;  %v265_v24 = vmul.f32 %v465_v4, %v233_v1  ;;  %p612_p0 = scmp.ne.s32.totalorder %s900_s21, %s611_s12  ;;  %s705_s18 = smov [#allocation8]  }
  0x5c   : > { %v242_v10 = vmul.f32 1.442695, %v240_v7  ;;  %v244_v11 = vmul.f32 1.442695, %v241_v8  ;;  %s615_s20 = sshll.u32 %s705_s18, 4  ;;  %s616_s20 = int_to_ptr.vmem [resolvable:$false] %s615_s20 }
  0x5d   : > { %318 = vst [vmem:[%s894_s26 + $0x10] sm:$0xff] %v301_v9  ;;  %v266_v32 = vsub.f32 %v262_v19, %v264_v20  ;;  %v267_v36 = vsub.f32 %v263_v23, %v265_v24  ;;  %p613_p11 = pnand %p612_p0, %p970_p3  ;;  %s617_s4 = scalar_lea.vmem %s616_s20, 1024 }
  0x5e   : > { %539 = vpow2.f32 %v242_v10  ;;  %p618_p7 = scmp.lt.s32.totalorder %s900_s21, %s616_s20  ;;  %p619_p10 = scmp.lt.s32.totalorder %s617_s4, %s611_s12 }
  0x5f   : > { %541 = vpow2.f32 %v244_v11  ;;  %p614_p13 = pneg %p613_p11 }
  0x60   : > { %p620_p12 = por %p619_p10, %p618_p7 }
  0x62   : > { %p621_p9 = pnand %p620_p12, %p614_p13 }
  0x68   : > { %v540_v12 = vpop.eup %539 }
  0x69   : > { %v542_v13 = vpop.eup %541  ;;  %v246_v14 = vadd.f32 1.0, %v540_v12  ;;  %v271_v16 = vmul.f32 -0.5, %v540_v12  ;;  %v274_v21 = vand.u32 2147483647, %v540_v12  ;;  %v258_v39 = vsel %vm256_vm0, 1.0, %v540_v12 }
  0x6a   : > { %v247_v15 = vadd.f32 1.0, %v542_v13  ;;  %v280_v17 = vmul.f32 -0.5, %v542_v13  ;;  %v283_v25 = vand.u32 2147483647, %v542_v13  ;;  %v259_v42 = vsel %vm257_vm1, 1.0, %v542_v13 }
  0x6b   : > { %543 = vrcp.f32 %v246_v14  ;;  %v272_v18 = vadd.f32 1.0, %v271_v16  ;;  %vm275_vm2 = vcmp.lt.f32.partialorder %v274_v21, 0.0004427343 }
  0x6c   : > { %545 = vrcp.f32 %v247_v15  ;;  %v281_v22 = vadd.f32 1.0, %v280_v17  ;;  %vm284_vm3 = vcmp.lt.f32.partialorder %v283_v25, 0.0004427343 }
  0x6d   : > { %547 = vlog2.f32 %v246_v14  ;;  %v273_v29 = vmul.f32 %v540_v12, %v272_v18 }
  0x6e   : > { %549 = vlog2.f32 %v247_v15  ;;  %v282_v33 = vmul.f32 %v542_v13, %v281_v22 }
  0x75   : > { %v544_v26 = vpop.eup %543 }
  0x76   : > { %v546_v27 = vpop.eup %545  ;;  %v250_v28 = vmul.f32 %v544_v26, %v246_v14 }
  0x77   : > { %v548_v30 = vpop.eup %547  ;;  %v251_v31 = vmul.f32 %v546_v27, %v247_v15 }
  0x78   : > { %v550_v34 = vpop.eup %549  ;;  %v252_v35 = vsub.f32 2.0, %v250_v28  ;;  %v270_v37 = vmul.f32 0.6931472, %v548_v30 }
  0x79   : > { %v253_v38 = vsub.f32 2.0, %v251_v31  ;;  %v279_v40 = vmul.f32 0.6931472, %v550_v34 }
  0x7a   : > { %v254_v41 = vmul.f32 %v544_v26, %v252_v35  ;;  %v276_v43 = vsel %vm275_vm2, %v273_v29, %v270_v37 }
  0x7b   : > { %v255_v44 = vmul.f32 %v546_v27, %v253_v38  ;;  %v285_v45 = vsel %vm284_vm3, %v282_v33, %v279_v40  ;;  %v286_v46 = vadd.f32 %v276_v43, %v266_v32 }
  0x7c   : > { %v260_v47 = vmul.f32 %v258_v39, %v254_v41  ;;  %v287_v48 = vadd.f32 %v285_v45, %v267_v36 }
  0x7d   : > { %v261_v49 = vmul.f32 %v259_v42, %v255_v44 }
  0x7e   : > { %v289_v50 = vmul.f32 %v464_v3, %v260_v47  ;;  %v306_v51 = vadd.f32 %v287_v48, %v286_v46 }
  0x7f   : > { %v290_v52 = vmul.f32 %v465_v4, %v261_v49  ;;  %v296_v53 = vadd.f32 %v261_v49, %v260_v47 }
  0x80   : > { %319 = vst [vmem:[%s894_s26 + $0x18] sm:$0xff] %v306_v51 }
  0x81   : > { %v291_v54 = vadd.f32 %v290_v52, %v289_v50  ;;  %317 = vst [vmem:[%s894_s26 + $0x8] sm:$0xff] %v296_v53 }
  0x83   : > { %316 = vst [vmem:[%s894_s26] sm:$0xff] %v291_v54 }
  0x84   : > { %624 = shalt.err (!%p621_p9)
}
  0x85   : > { %s625_s27 = scalar_lea.hbm %s906_s8, 512  ;;  %s629_s25 = scalar_lea.hbm %s959_s2, 1024 }
  0x86   : > { %p626_p1 = scmp.ne.s32.totalorder %s906_s8, %s625_s27  ;;  %p630_p5 = scmp.lt.u32.totalorder %s906_s8, %s959_s2 }
  0x87   : > { %p631_p4 = scmp.lt.u32.totalorder %s629_s25, %s625_s27  ;;  %p633_p0 = scmp.lt.u32.totalorder %s625_s27, %s906_s8 }
  0x88   : > { %p627_p6 = pnand %p626_p1, %p970_p3 }
  0x89   : > { %p632_p8 = por %p631_p4, %p630_p5 }
  0x8a   : > { %p628_p2 = pneg %p627_p6 }
  0x8b   : > { %p634_p11 = por %p633_p0, %p632_p8 }
  0x8d   : > { %p635_p13 = pnand %p634_p11, %p628_p2 }
  0x8f   : > { %638 = shalt.err (!%p635_p13)
}
  0x90   : > { %s706_s19 = smov 128   ;;  %s707_s26 = smov 8  }
  0x91   : > { %470 = dma.vmem_to_hbm [thread:$0]  (%p970_p3), %s900_s21, 512, %s906_s8, %s321_s16, %s706_s19, %s706_s19, %s707_s26  }
  0x92 PF: > { %s349_s30 = sand.u32 1, %s677_s9   ;;  %p971_p7 = scmp.ne.s32.totalorder %s965_s24, 0 }
  0x93   : > { %p972_p10 = scmp.ge.s32.totalorder %s697_s14, 2  ;;  %s350_s3 = scalar_lea.sflag [#allocation5], %s349_s30 }
  0x95   : > { %p480_p12 = pnand %p972_p10, %p971_p7 }
  0x97   : > { %672 = dma.done.wait (!%p480_p12), %s350_s3, 512  }
  0x98   : > { %674 = vsyncadd (!%p480_p12), %s350_s3, 4294966784  ;;  %s21_s14 = sadd.s32 1, %s697_s14   ;;  %s973_s9 = smov %s681_s10 }
  0x99   : > { %p18_p9 = scmp.ge.s32.totalorder %s21_s14, 4   ;;  %s974_s10 = smov %s685_s11 }
  0x9a   : > { %s975_s11 = smov %s779_s23  ;;  %s976_s12 = smov %s693_s13 }
  0x9b   : > { %s977_s13 = smov %s979_s17  ;;  %20 = sbr.rel (!%p18_p9) target bundleno = 8 (0x8), region = 97 }
  0xa2   :  { %355 = vsyncpa [#allocation4], 1 }
  0xa3   :  { %357 = vsyncpa [#allocation4 + $0x1], 1 }
  0xa4   :  { %358 = vsyncpa [#allocation7], 1 }
  0xa5   :  { %360 = vsyncpa [#allocation7 + $0x1], 1 }
  0xa6   :  { %361 = vsyncpa [#allocation5], 1 }
  0xa7   :  { %363 = vsyncpa [#allocation5 + $0x1], 1 }

</bundles_post_ra>
